<compile_context>
chip_gen: v7x
topology: tpu7x:2x2x1
jax: 0.10.0
libtpu: 0.0.40
codegen_flags: <defaults>
</compile_context>

<pallas_src>
import jax
import jax.numpy as jnp
from jax.experimental import pallas as pl
from jax.experimental.pallas import tpu as pltpu


def _round_up(x: int, m: int) -> int:
    return (x + m - 1) // m * m


def _row_tile_cap() -> int:
    # 256-row tiles feed the 2x256^2 MXU on v6e/v7x; v5e's 4x128^2 MXU (and
    # f32-only EUP for tanh) favors 128-row tiles.
    try:
        kind = jax.devices()[0].device_kind.lower()
    except Exception:
        return 128
    for old in ("v2", "v3", "v4", "v5"):
        if old in kind:
            return 128
    return 256


def _vmem_capacity_bytes() -> int:
    try:
        return int(pltpu.get_tpu_info().vmem_capacity_bytes)
    except Exception:
        return 64 << 20  # conservative fallback: v7x per-TensorCore VMEM


def _ffcombiner_kernel(head_ref, mod_ref, w1_ref, b1_ref, w2_ref, b2_ref, o_ref):
    # head_ref/mod_ref: (tm, E_pad) activations (f32 or bf16)
    # w1_ref: (2*E_pad, E_pad), w2_ref: (E_pad, E_pad) in weight dtype (bf16/f32)
    # b1_ref/b2_ref: (1, E_pad) f32; o_ref: (tm, E_pad) f32
    w_dtype = w1_ref.dtype
    # Lane-concat head|modifier in VMEM -> one fused K=2*E_pad matmul.
    x = jnp.concatenate(
        [head_ref[...].astype(w_dtype), mod_ref[...].astype(w_dtype)], axis=-1)
    pre = jnp.dot(x, w1_ref[...], preferred_element_type=jnp.float32) + b1_ref[...]
    h = jnp.tanh(pre)  # EUP, f32
    y = jnp.dot(h.astype(w_dtype), w2_ref[...],
                preferred_element_type=jnp.float32) + b2_ref[...]
    o_ref[...] = y.astype(o_ref.dtype)


def ffcombiner_batched(heads, mods, params):
    """heads, mods: (B, E) float. Returns (B, E) float32 (row i = FFCombiner(row i))."""
    B, E = heads.shape
    assert E == params["E"] and mods.shape == heads.shape
    E_pad = params["E_pad"]
    w_dtype = params["w1"].dtype
    wbytes = w_dtype.itemsize

    # ---- row tile ------------------------------------------------------------
    cap = _row_tile_cap()
    b16 = _round_up(B, 16)          # 16-row alignment keeps bf16 activation tiles native
    if b16 <= 128:
        tm = b16
    elif cap >= 256 and b16 >= 512:
        tm = 256                    # fills the 256-wide MXU; still >= 2 grid steps (v7x dual TC)
    else:
        tm = 128
    B_pad = _round_up(B, tm)
    grid = (B_pad // tm,)

    # ---- activations: pad/cast only when actually needed ----------------------
    needs_pad = (B_pad != B) or (E_pad != E)
    # When we pad anyway, the bf16 cast rides the same HBM pass; otherwise pass
    # through untouched (no extra wrapper-side astype pass) and cast in-kernel.
    act_dtype = w_dtype if (needs_pad and wbytes < 4) else heads.dtype
    if needs_pad:
        def pad_in(x):
            return jnp.pad(x, ((0, B_pad - B), (0, E_pad - E))).astype(act_dtype)
        heads_p, mods_p = pad_in(heads), pad_in(mods)
    else:
        heads_p, mods_p = heads, mods
    abytes = jnp.dtype(act_dtype).itemsize

    # ---- cost estimate ---------------------------------------------------------
    flops = 2 * B_pad * (2 * E_pad) * E_pad + 2 * B_pad * E_pad * E_pad
    cost = pl.CostEstimate(
        flops=flops,
        transcendentals=B_pad * E_pad,
        bytes_accessed=(2 * B_pad * E_pad * abytes + B_pad * E_pad * 4
                        + 3 * E_pad * E_pad * wbytes + 2 * E_pad * 4))

    vmem_cap = _vmem_capacity_bytes()

    def _run(single_buffer_weights: bool):
        # VMEM bookkeeping: weights/biases single-buffered (constant index_map)
        # when supported, activations/output double-buffered, plus in-kernel temps.
        wq = 1 if single_buffer_weights else 2
        vmem_need = (wq * (3 * E_pad * E_pad * wbytes + 2 * 8 * E_pad * 4)
                     + 2 * (2 * tm * E_pad * abytes + tm * E_pad * 4)
                     + tm * 2 * E_pad * wbytes + 2 * tm * E_pad * 4)
        # Always set the scoped-VMEM limit from the computed need (+25% headroom),
        # floored at 32 MiB and clamped to physical VMEM minus 8 MiB (v7x: 64 MiB/TC).
        vmem_limit = min(max(int(vmem_need * 5 // 4), 32 << 20),
                         vmem_cap - (8 << 20))
        # TODO(synk): once resident weights exceed ~half of VMEM (f32: E_pad >~1.3-1.5K
        # on v7x, >~2K on v5e/v6e), grid-tile W1/W2 over N (and K) with a VMEM
        # accumulator + pl.when init/finalize instead of just raising the limit.

        resident = dict(pipeline_mode=pl.Buffered(1)) if single_buffer_weights else {}
        in_specs = [
            pl.BlockSpec((tm, E_pad), lambda i: (i, 0)),                      # head rows
            pl.BlockSpec((tm, E_pad), lambda i: (i, 0)),                      # modifier rows
            pl.BlockSpec((2 * E_pad, E_pad), lambda i: (0, 0), **resident),   # W1 (resident)
            pl.BlockSpec((1, E_pad), lambda i: (0, 0), **resident),           # b1
            pl.BlockSpec((E_pad, E_pad), lambda i: (0, 0), **resident),       # W2 (resident)
            pl.BlockSpec((1, E_pad), lambda i: (0, 0), **resident),           # b2
        ]
        return pl.pallas_call(
            _ffcombiner_kernel,
            out_shape=jax.ShapeDtypeStruct((B_pad, E_pad), jnp.float32),
            grid=grid,
            in_specs=in_specs,
            out_specs=pl.BlockSpec((tm, E_pad), lambda i: (i, 0)),
            compiler_params=pltpu.CompilerParams(
                dimension_semantics=("parallel",),
                vmem_limit_bytes=vmem_limit),
            cost_estimate=cost,
        )(heads_p, mods_p, params["w1"], params["b1"], params["w2"], params["b2"])

    try:
        out_p = _run(single_buffer_weights=True)
    except Exception:
        # Fallback for jax versions where pipeline_mode/Buffered(1) is not honored
        # on the top-level pallas_call: plain double-buffered resident weights.
        out_p = _run(single_buffer_weights=False)

    if needs_pad:
        return out_p[:B, :E]
    return out_p


def ffcombiner_forward(head_embed, modifier_embed, params):
    """Module-equivalent forward: head_embed, modifier_embed (1, E) -> (1, E).

    torch's cat(head_embed[0], modifier_embed[0]) happens inside the kernel as a
    VMEM lane-concat feeding a single fused K=2*E_pad matmul.
    """
    return ffcombiner_batched(head_embed[0:1], modifier_embed[0:1], params)


def init_params(key, embedding_dim, weight_dtype=jnp.bfloat16):
    """nn.Linear-style U(-1/sqrt(fan_in), 1/sqrt(fan_in)) init.

    Weights are stored transposed vs PyTorch ((in_features, out_features)),
    zero-padded to lane-dense multiples of 128, and cast to `weight_dtype`
    (bf16 default: halves weight HBM traffic in the weight-DMA-bound B=1 regime
    and hits the fast bf16 MXU path; pass jnp.float32 for exact f32 math).
    W1 keeps head rows at [0:E] and modifier rows at [E_pad:E_pad+E] so the
    kernel's (head | modifier) lane-concat lines up with it.
    NOTE: for E << 128 the zero padding is numerically exact but inflates weight
    bytes/FLOPs by (E_pad/E)^2 in that configuration.
    """
    E = embedding_dim
    E_pad = _round_up(max(E, 128), 128)
    k1, k2, k3, k4 = jax.random.split(key, 4)
    bound1 = 1.0 / jnp.sqrt(2.0 * E)
    bound2 = 1.0 / jnp.sqrt(1.0 * E)

    w1 = jax.random.uniform(k1, (2 * E, E), jnp.float32, -bound1, bound1)
    b1 = jax.random.uniform(k2, (E,), jnp.float32, -bound1, bound1)
    w2 = jax.random.uniform(k3, (E, E), jnp.float32, -bound2, bound2)
    b2 = jax.random.uniform(k4, (E,), jnp.float32, -bound2, bound2)

    wdt = jnp.dtype(weight_dtype)
    # TODO(synk): add an fp8 (float8_e4m3fn) weight-storage path gated on v7x only
    # (its MXU consumes fp8 natively) to quarter weight HBM bytes vs f32.
    w1p = (jnp.zeros((2 * E_pad, E_pad), wdt)
           .at[:E, :E].set(w1[:E].astype(wdt))
           .at[E_pad:E_pad + E, :E].set(w1[E:].astype(wdt)))
    w2p = jnp.zeros((E_pad, E_pad), wdt).at[:E, :E].set(w2.astype(wdt))
    b1p = jnp.zeros((1, E_pad), jnp.float32).at[0, :E].set(b1)
    b2p = jnp.zeros((1, E_pad), jnp.float32).at[0, :E].set(b2)

    return {"w1": w1p, "b1": b1p, "w2": w2p, "b2": b2p, "E": E, "E_pad": E_pad}


def reference_forward(heads, mods, params):
    """Pure-JAX reference replicating the kernel's dtype path exactly:
    weights AND activations quantized to the stored weight dtype, f32 accumulation."""
    E, E_pad = params["E"], params["E_pad"]
    wdt = params["w1"].dtype
    w1 = jnp.concatenate(
        [params["w1"][:E, :E], params["w1"][E_pad:E_pad + E, :E]], axis=0)
    w2 = params["w2"][:E, :E]
    b1 = params["b1"][:, :E]
    b2 = params["b2"][:, :E]
    x = jnp.concatenate([heads, mods], axis=-1).astype(wdt)
    h = jnp.tanh(jnp.dot(x, w1, preferred_element_type=jnp.float32) + b1)
    return jnp.dot(h.astype(wdt), w2, preferred_element_type=jnp.float32) + b2


if __name__ == "__main__":
    E = 32
    key = jax.random.PRNGKey(0)
    kp, kh, km, kb = jax.random.split(key, 4)

    head_embed = jax.random.normal(kh, (1, E), jnp.float32)
    modifier_embed = jax.random.normal(km, (1, E), jnp.float32)

    # --- default path: bf16 weights (weight-HBM-bound B=1 regime) --------------
    params = init_params(kp, E)
    out = jax.block_until_ready(ffcombiner_forward(head_embed, modifier_embed, params))
    ref = reference_forward(head_embed, modifier_embed, params)
    assert out.shape == (1, E)
    assert jnp.allclose(out, ref, atol=1e-2, rtol=1e-2)

    # --- f32-weight path: exact-semantics anchor (tight tolerance) -------------
    params_f32 = init_params(kp, E, weight_dtype=jnp.float32)
    out32 = jax.block_until_ready(
        ffcombiner_forward(head_embed, modifier_embed, params_f32))
    ref32 = reference_forward(head_embed, modifier_embed, params_f32)
    assert out32.shape == (1, E)
    assert jnp.allclose(out32, ref32, atol=1e-4, rtol=1e-4)

    # --- batched path: amortizes the weight DMA over B rows --------------------
    B = 16
    kh2, km2 = jax.random.split(kb)
    heads = jax.random.normal(kh2, (B, E), jnp.float32)
    mods = jax.random.normal(km2, (B, E), jnp.float32)
    out_b = jax.block_until_ready(ffcombiner_batched(heads, mods, params))
    ref_b = reference_forward(heads, mods, params)
    assert out_b.shape == (B, E)
    assert jnp.allclose(out_b, ref_b, atol=1e-2, rtol=1e-2)

    print("KERNEL_OK")
</pallas_src>

<mosaic_0001>
module attributes {stable_mosaic.version = 11 : i64} {
  func.func @_ffcombiner_kernel(%arg0: i32, %arg1: memref<16x128xbf16, #tpu.memory_space<vmem>>, %arg2: memref<16x128xbf16, #tpu.memory_space<vmem>>, %arg3: memref<256x128xbf16, #tpu.memory_space<vmem>>, %arg4: memref<1x128xf32, #tpu.memory_space<vmem>>, %arg5: memref<128x128xbf16, #tpu.memory_space<vmem>>, %arg6: memref<1x128xf32, #tpu.memory_space<vmem>>, %arg7: memref<16x128xf32, #tpu.memory_space<vmem>>) attributes {dimension_semantics = [#tpu.dimension_semantics<parallel>], iteration_bounds = array<i64: 1>, scalar_prefetch = 0 : i64, scratch_operands = 0 : i64, tpu.core_type = #tpu.core_type<tc>, window_params = [{transform_indices = @transform_0, window_bounds = array<i64: 16, 128>}, {transform_indices = @transform_1, window_bounds = array<i64: 16, 128>}, {pipeline_mode = #tpu.pipeline_mode<synchronous>, transform_indices = @transform_2, window_bounds = array<i64: 256, 128>}, {pipeline_mode = #tpu.pipeline_mode<synchronous>, transform_indices = @transform_3, window_bounds = array<i64: 1, 128>}, {pipeline_mode = #tpu.pipeline_mode<synchronous>, transform_indices = @transform_4, window_bounds = array<i64: 128, 128>}, {pipeline_mode = #tpu.pipeline_mode<synchronous>, transform_indices = @transform_5, window_bounds = array<i64: 1, 128>}, {transform_indices = @transform_6, window_bounds = array<i64: 16, 128>}]} {
    %c0 = arith.constant 0 : index
    %c0_0 = arith.constant 0 : index
    %0 = vector.load %arg1[%c0, %c0_0] : memref<16x128xbf16, #tpu.memory_space<vmem>>, vector<16x128xbf16>
    %c0_1 = arith.constant 0 : index
    %c0_2 = arith.constant 0 : index
    %1 = vector.load %arg2[%c0_1, %c0_2] : memref<16x128xbf16, #tpu.memory_space<vmem>>, vector<16x128xbf16>
    %2 = tpu.concatenate %0, %1 in 1 : vector<16x128xbf16>, vector<16x128xbf16> -> vector<16x256xbf16>
    %c0_3 = arith.constant 0 : index
    %c0_4 = arith.constant 0 : index
    %3 = vector.load %arg3[%c0_3, %c0_4] : memref<256x128xbf16, #tpu.memory_space<vmem>>, vector<256x128xbf16>
    %cst = arith.constant dense<0.000000e+00> : vector<16x128xf32>
    %4 = tpu.matmul %2, %3, %cst {dimension_numbers = #tpu.dot_dimension_numbers<[1], [0], [0], [1], [0, 0, 1, 1], [], []>} : vector<16x256xbf16>, vector<256x128xbf16>, vector<16x128xf32> -> vector<16x128xf32>
    %c0_5 = arith.constant 0 : index
    %c0_6 = arith.constant 0 : index
    %5 = vector.load %arg4[%c0_5, %c0_6] : memref<1x128xf32, #tpu.memory_space<vmem>>, vector<1x128xf32>
    %6 = vector.broadcast %5 : vector<1x128xf32> to vector<16x128xf32>
    %7 = arith.addf %4, %6 : vector<16x128xf32>
    %8 = math.tanh %7 : vector<16x128xf32>
    %9 = arith.truncf %8 : vector<16x128xf32> to vector<16x128xbf16>
    %c0_7 = arith.constant 0 : index
    %c0_8 = arith.constant 0 : index
    %10 = vector.load %arg5[%c0_7, %c0_8] : memref<128x128xbf16, #tpu.memory_space<vmem>>, vector<128x128xbf16>
    %cst_9 = arith.constant dense<0.000000e+00> : vector<16x128xf32>
    %11 = tpu.matmul %9, %10, %cst_9 {dimension_numbers = #tpu.dot_dimension_numbers<[1], [0], [0], [1], [0, 0, 1, 1], [], []>} : vector<16x128xbf16>, vector<128x128xbf16>, vector<16x128xf32> -> vector<16x128xf32>
    %c0_10 = arith.constant 0 : index
    %c0_11 = arith.constant 0 : index
    %12 = vector.load %arg6[%c0_10, %c0_11] : memref<1x128xf32, #tpu.memory_space<vmem>>, vector<1x128xf32>
    %13 = vector.broadcast %12 : vector<1x128xf32> to vector<16x128xf32>
    %14 = arith.addf %11, %13 : vector<16x128xf32>
    %c0_12 = arith.constant 0 : index
    %c0_13 = arith.constant 0 : index
    %15 = vector.load %arg7[%c0_12, %c0_13] : memref<16x128xf32, #tpu.memory_space<vmem>>, vector<16x128xf32>
    tpu.vector_store %arg7[%c0_12, %c0_13], %14 {strides = array<i32>} : memref<16x128xf32, #tpu.memory_space<vmem>>, vector<16x128xf32>,
    return
  }
  func.func @transform_0(%arg0: i32) -> (i32, i32) {
    %c0_i32 = arith.constant 0 : i32
    %c0_i32_0 = arith.constant 0 : i32
    return %arg0, %c0_i32 : i32, i32
  }
  func.func @transform_1(%arg0: i32) -> (i32, i32) {
    %c0_i32 = arith.constant 0 : i32
    %c0_i32_0 = arith.constant 0 : i32
    return %arg0, %c0_i32 : i32, i32
  }
  func.func @transform_2(%arg0: i32) -> (i32, i32) {
    %c0_i32 = arith.constant 0 : i32
    %c0_i32_0 = arith.constant 0 : i32
    %c0_i32_1 = arith.constant 0 : i32
    return %c0_i32, %c0_i32_0 : i32, i32
  }
  func.func @transform_3(%arg0: i32) -> (i32, i32) {
    %c0_i32 = arith.constant 0 : i32
    %c0_i32_0 = arith.constant 0 : i32
    %c0_i32_1 = arith.constant 0 : i32
    return %c0_i32, %c0_i32_0 : i32, i32
  }
  func.func @transform_4(%arg0: i32) -> (i32, i32) {
    %c0_i32 = arith.constant 0 : i32
    %c0_i32_0 = arith.constant 0 : i32
    %c0_i32_1 = arith.constant 0 : i32
    return %c0_i32, %c0_i32_0 : i32, i32
  }
  func.func @transform_5(%arg0: i32) -> (i32, i32) {
    %c0_i32 = arith.constant 0 : i32
    %c0_i32_0 = arith.constant 0 : i32
    %c0_i32_1 = arith.constant 0 : i32
    return %c0_i32, %c0_i32_0 : i32, i32
  }
  func.func @transform_6(%arg0: i32) -> (i32, i32) {
    %c0_i32 = arith.constant 0 : i32
    %c0_i32_0 = arith.constant 0 : i32
    return %arg0, %c0_i32 : i32, i32
  }
}

module attributes {stable_mosaic.version = 11 : i64} {
  func.func @_ffcombiner_kernel(%arg0: i32, %arg1: memref<16x128xbf16, #tpu.memory_space<vmem>>, %arg2: memref<16x128xbf16, #tpu.memory_space<vmem>>, %arg3: memref<256x128xbf16, #tpu.memory_space<vmem>>, %arg4: memref<1x128xf32, #tpu.memory_space<vmem>>, %arg5: memref<128x128xbf16, #tpu.memory_space<vmem>>, %arg6: memref<1x128xf32, #tpu.memory_space<vmem>>, %arg7: memref<16x128xf32, #tpu.memory_space<vmem>>) attributes {dimension_semantics = [#tpu.dimension_semantics<parallel>], iteration_bounds = array<i64: 1>, scalar_prefetch = 0 : i64, scratch_operands = 0 : i64, tpu.core_type = #tpu.core_type<tc>, window_params = [{transform_indices = @transform_0, window_bounds = array<i64: 16, 128>}, {transform_indices = @transform_1, window_bounds = array<i64: 16, 128>}, {pipeline_mode = #tpu.pipeline_mode<synchronous>, transform_indices = @transform_2, window_bounds = array<i64: 256, 128>}, {pipeline_mode = #tpu.pipeline_mode<synchronous>, transform_indices = @transform_3, window_bounds = array<i64: 1, 128>}, {pipeline_mode = #tpu.pipeline_mode<synchronous>, transform_indices = @transform_4, window_bounds = array<i64: 128, 128>}, {pipeline_mode = #tpu.pipeline_mode<synchronous>, transform_indices = @transform_5, window_bounds = array<i64: 1, 128>}, {transform_indices = @transform_6, window_bounds = array<i64: 16, 128>}]} {
    %c0 = arith.constant 0 : index
    %c0_0 = arith.constant 0 : index
    %0 = vector.load %arg1[%c0, %c0_0] : memref<16x128xbf16, #tpu.memory_space<vmem>>, vector<16x128xbf16>
    %c0_1 = arith.constant 0 : index
    %c0_2 = arith.constant 0 : index
    %1 = vector.load %arg2[%c0_1, %c0_2] : memref<16x128xbf16, #tpu.memory_space<vmem>>, vector<16x128xbf16>
    %2 = tpu.concatenate %0, %1 in 1 : vector<16x128xbf16>, vector<16x128xbf16> -> vector<16x256xbf16>
    %c0_3 = arith.constant 0 : index
    %c0_4 = arith.constant 0 : index
    %3 = vector.load %arg3[%c0_3, %c0_4] : memref<256x128xbf16, #tpu.memory_space<vmem>>, vector<256x128xbf16>
    %cst = arith.constant dense<0.000000e+00> : vector<16x128xf32>
    %4 = tpu.matmul %2, %3, %cst {dimension_numbers = #tpu.dot_dimension_numbers<[1], [0], [0], [1], [0, 0, 1, 1], [], []>} : vector<16x256xbf16>, vector<256x128xbf16>, vector<16x128xf32> -> vector<16x128xf32>
    %c0_5 = arith.constant 0 : index
    %c0_6 = arith.constant 0 : index
    %5 = vector.load %arg4[%c0_5, %c0_6] : memref<1x128xf32, #tpu.memory_space<vmem>>, vector<1x128xf32>
    %6 = vector.broadcast %5 : vector<1x128xf32> to vector<16x128xf32>
    %7 = arith.addf %4, %6 : vector<16x128xf32>
    %8 = math.tanh %7 : vector<16x128xf32>
    %9 = arith.truncf %8 : vector<16x128xf32> to vector<16x128xbf16>
    %c0_7 = arith.constant 0 : index
    %c0_8 = arith.constant 0 : index
    %10 = vector.load %arg5[%c0_7, %c0_8] : memref<128x128xbf16, #tpu.memory_space<vmem>>, vector<128x128xbf16>
    %cst_9 = arith.constant dense<0.000000e+00> : vector<16x128xf32>
    %11 = tpu.matmul %9, %10, %cst_9 {dimension_numbers = #tpu.dot_dimension_numbers<[1], [0], [0], [1], [0, 0, 1, 1], [], []>} : vector<16x128xbf16>, vector<128x128xbf16>, vector<16x128xf32> -> vector<16x128xf32>
    %c0_10 = arith.constant 0 : index
    %c0_11 = arith.constant 0 : index
    %12 = vector.load %arg6[%c0_10, %c0_11] : memref<1x128xf32, #tpu.memory_space<vmem>>, vector<1x128xf32>
    %13 = vector.broadcast %12 : vector<1x128xf32> to vector<16x128xf32>
    %14 = arith.addf %11, %13 : vector<16x128xf32>
    %c0_12 = arith.constant 0 : index
    %c0_13 = arith.constant 0 : index
    %15 = vector.load %arg7[%c0_12, %c0_13] : memref<16x128xf32, #tpu.memory_space<vmem>>, vector<16x128xf32>
    tpu.vector_store %arg7[%c0_12, %c0_13], %14 {strides = array<i32>} : memref<16x128xf32, #tpu.memory_space<vmem>>, vector<16x128xf32>,
    return
  }
  func.func @transform_0(%arg0: i32) -> (i32, i32) {
    %c0_i32 = arith.constant 0 : i32
    %c0_i32_0 = arith.constant 0 : i32
    return %arg0, %c0_i32 : i32, i32
  }
  func.func @transform_1(%arg0: i32) -> (i32, i32) {
    %c0_i32 = arith.constant 0 : i32
    %c0_i32_0 = arith.constant 0 : i32
    return %arg0, %c0_i32 : i32, i32
  }
  func.func @transform_2(%arg0: i32) -> (i32, i32) {
    %c0_i32 = arith.constant 0 : i32
    %c0_i32_0 = arith.constant 0 : i32
    %c0_i32_1 = arith.constant 0 : i32
    return %c0_i32, %c0_i32_0 : i32, i32
  }
  func.func @transform_3(%arg0: i32) -> (i32, i32) {
    %c0_i32 = arith.constant 0 : i32
    %c0_i32_0 = arith.constant 0 : i32
    %c0_i32_1 = arith.constant 0 : i32
    return %c0_i32, %c0_i32_0 : i32, i32
  }
  func.func @transform_4(%arg0: i32) -> (i32, i32) {
    %c0_i32 = arith.constant 0 : i32
    %c0_i32_0 = arith.constant 0 : i32
    %c0_i32_1 = arith.constant 0 : i32
    return %c0_i32, %c0_i32_0 : i32, i32
  }
  func.func @transform_5(%arg0: i32) -> (i32, i32) {
    %c0_i32 = arith.constant 0 : i32
    %c0_i32_0 = arith.constant 0 : i32
    %c0_i32_1 = arith.constant 0 : i32
    return %c0_i32, %c0_i32_0 : i32, i32
  }
  func.func @transform_6(%arg0: i32) -> (i32, i32) {
    %c0_i32 = arith.constant 0 : i32
    %c0_i32_0 = arith.constant 0 : i32
    return %arg0, %c0_i32 : i32, i32
  }
}

</mosaic_0001>

<bundles_post_ra>
// kernel: tpu_custom_call.1
= control target key start
LH: loop header
LB: loop body
LE: loop exit
PB: predicated region body
PF: predicated region fallthrough
CT: control target
= control target key end

     0   :  { %11 = vsyncpa [#allocation3], 0  ;;  %s784_s0 = inlined_call_operand.hbm [shape: bf16[16,128], index: 0, kind: input, shape index: {}]   ;;  %s785_s1 = inlined_call_operand.hbm [shape: bf16[16,128], index: 1, kind: input, shape index: {}]   ;;  %s786_s2 = inlined_call_operand.hbm [shape: bf16[256,128], index: 2, kind: input, shape index: {}]   ;;  %s787_s3 = inlined_call_operand.vmem [shape: f32[1,128], index: 3, kind: input, shape index: {}]   ;;  %s788_s4 = inlined_call_operand.hbm [shape: bf16[128,128], index: 4, kind: input, shape index: {}]   ;;  %s789_s5 = inlined_call_operand.vmem [shape: f32[1,128], index: 5, kind: input, shape index: {}]   ;;  %s790_s6 = inlined_call_operand.hbm [shape: f32[16,128], index: 6, kind: output, shape index: {}]  }
   0x1   :  { %12 = vsyncpa [#allocation6], 0 }
   0x2   :  { %13 = vsyncpa [#allocation9], 0 }
   0x3   :  { %14 = vsyncpa [#allocation4], 0  ;;  %s646_s21 = smov [#allocation5]   ;;  %s647_s23 = smov [#allocation2]  }
   0x4   :  { %s32_s22 = sshll.u32 %s646_s21, 4  ;;  %s20_s24 = sshll.u32 %s647_s23, 4  ;;  %s33_s22 = int_to_ptr.vmem [resolvable:$true] %s32_s22  ;;  %s692_s24 = int_to_ptr.vmem [resolvable:$true] %s20_s24 }
   0x5   :  { %s528_s27 = scalar_lea.hbm %s785_s1, 128 }
   0x6   :  { %p529_p0 = scmp.ne.s32.totalorder %s785_s1, %s528_s27  ;;  %p532_p1 = scmp.lt.u32.totalorder %s528_s27, %s785_s1 }
   0x8   :  { %p534_p2 = pnand %p532_p1, %p529_p0 }
   0xa   :  { %537 = shalt.err (!%p534_p2)
}
   0xb   :  { %s538_s8 = scalar_lea.vmem %s33_s22, 128  ;;  %p543_p4 = scmp.lt.s32.totalorder %s33_s22, %s33_s22 }
   0xc   :  { %p539_p3 = scmp.ne.s32.totalorder %s33_s22, %s538_s8  ;;  %p544_p5 = scmp.lt.s32.totalorder %s538_s8, %s538_s8 }
   0xe   :  { %p545_p6 = por %p544_p5, %p543_p4 }
  0x10   :  { %p546_p7 = pnand %p545_p6, %p539_p3 }
  0x12   :  { %549 = shalt.err (!%p546_p7)
}
  0x13   :  { %s648_s9 = smov 64   ;;  %s649_s10 = smov 4  }
  0x14   :  { %38 = dma.hbm_to_vmem [thread:$0]  %s785_s1, 128, %s33_s22, [#allocation6], %s648_s9, %s648_s9, %s649_s10  }
  0x15   :  { %s550_s15 = scalar_lea.hbm %s784_s0, 128 }
  0x16   :  { %p551_p8 = scmp.ne.s32.totalorder %s784_s0, %s550_s15  ;;  %p554_p9 = scmp.lt.u32.totalorder %s550_s15, %s784_s0 }
  0x18   :  { %p556_p10 = pnand %p554_p9, %p551_p8 }
  0x1a   :  { %559 = shalt.err (!%p556_p10)
}
  0x1b   :  { %s560_s20 = scalar_lea.vmem %s692_s24, 128  ;;  %p565_p12 = scmp.lt.s32.totalorder %s692_s24, %s692_s24 }
  0x1c   :  { %p561_p11 = scmp.ne.s32.totalorder %s692_s24, %s560_s20  ;;  %p566_p13 = scmp.lt.s32.totalorder %s560_s20, %s560_s20 }
  0x1e   :  { %p567_p0 = por %p566_p13, %p565_p12 }
  0x20   :  { %p568_p1 = pnand %p567_p0, %p561_p11 }
  0x22   :  { %571 = shalt.err (!%p568_p1)
}
  0x23   :  { %26 = dma.hbm_to_vmem [thread:$0]  %s784_s0, 128, %s692_s24, [#allocation3], %s648_s9, %s648_s9, %s649_s10  }
  0x24   :  { %s650_s22 = smov [#allocation7]   ;;  %s651_s25 = smov [#allocation8]  }
  0x25   :  { %s44_s23 = sshll.u32 %s650_s22, 4  ;;  %s58_s26 = sshll.u32 %s651_s25, 4  ;;  %s45_s23 = int_to_ptr.vmem [resolvable:$true] %s44_s23  ;;  %s729_s26 = int_to_ptr.vmem [resolvable:$true] %s58_s26 }
  0x26   :  { %s572_s29 = scalar_lea.hbm %s786_s2, 2048 }
  0x27   :  { %p573_p2 = scmp.ne.s32.totalorder %s786_s2, %s572_s29  ;;  %p576_p3 = scmp.lt.u32.totalorder %s572_s29, %s786_s2 }
  0x29   :  { %p578_p4 = pnand %p576_p3, %p573_p2 }
  0x2b   :  { %581 = shalt.err (!%p578_p4)
}
  0x2c   :  { %s582_s0 = scalar_lea.vmem %s45_s23, 2048  ;;  %p587_p6 = scmp.lt.s32.totalorder %s45_s23, %s45_s23 }
  0x2d   :  { %p583_p5 = scmp.ne.s32.totalorder %s45_s23, %s582_s0  ;;  %p588_p7 = scmp.lt.s32.totalorder %s582_s0, %s582_s0 }
  0x2f   :  { %p589_p8 = por %p588_p7, %p587_p6 }
  0x31   :  { %p590_p9 = pnand %p589_p8, %p583_p5 }
  0x33   :  { %593 = shalt.err (!%p590_p9)
}
  0x34   :  { %50 = dma.hbm_to_vmem [thread:$0]  %s786_s2, 2048, %s45_s23, [#allocation6], %s648_s9, %s648_s9, %s649_s10  }
  0x35   :  { %s594_s15 = scalar_lea.hbm %s788_s4, 1024 }
  0x36   :  { %p595_p10 = scmp.ne.s32.totalorder %s788_s4, %s594_s15  ;;  %p598_p11 = scmp.lt.u32.totalorder %s594_s15, %s788_s4 }
  0x38   :  { %p600_p12 = pnand %p598_p11, %p595_p10 }
  0x3a   :  { %603 = shalt.err (!%p600_p12)
}
  0x3b   :  { %s604_s20 = scalar_lea.vmem %s729_s26, 1024  ;;  %p609_p0 = scmp.lt.s32.totalorder %s729_s26, %s729_s26 }
  0x3c   :  { %p605_p13 = scmp.ne.s32.totalorder %s729_s26, %s604_s20  ;;  %p610_p1 = scmp.lt.s32.totalorder %s604_s20, %s604_s20 }
  0x3e   :  { %p611_p2 = por %p610_p1, %p609_p0 }
  0x40   :  { %p612_p3 = pnand %p611_p2, %p605_p13 }
  0x42   :  { %615 = shalt.err (!%p612_p3)
}
  0x43   :  { %64 = dma.hbm_to_vmem [thread:$0]  %s788_s4, 1024, %s729_s26, [#allocation9], %s648_s9, %s648_s9, %s649_s10  }
  0x44   :  { %638 = dma.done.wait [#allocation3], 128  }
  0x45   :  { %639 = vsyncadd [#allocation3], 4294967168 }
  0x46   :  { %640 = dma.done.wait [#allocation6], 2176  }
  0x47   :  { %641 = vsyncadd [#allocation6], 4294965120 }
  0x48   :  { %642 = dma.done.wait [#allocation9], 1024  }
  0x49   :  { %643 = vsyncadd [#allocation9], 4294966272  ;;  %v652_v0 = vmov 0.0   ;;  %v498_v1 = vld [vmem:[#allocation7 + $0x40] sm:$0xff]   ;;  %v500_v3 = vld [vmem:[#allocation7 + $0x48] sm:$0xff]   ;;  %vm653_vm0 = vmmov 0  }
  0x4a   :  { %467 = vmatprep.subr.bf16.mxu1 %v652_v0  ;;  %v499_v2 = vld [vmem:[#allocation7] sm:$0xff]   ;;  %436 = vmatprep.subr.bf16.mxu0 %v498_v1  ;;  %v501_v4 = vld [vmem:[#allocation7 + $0x8] sm:$0xff]   ;;  %v502_v5 = vld [vmem:[#allocation7 + $0x50] sm:$0xff]   ;;  %s654_s22 = smov [#allocation10]  }
  0x4b   :  { %437 = vmatpush3.bf16.msra.mxu0 %v499_v2  ;;  %v503_v6 = vld [vmem:[#allocation7 + $0x10] sm:$0xff]   ;;  %v504_v7 = vld [vmem:[#allocation7 + $0x58] sm:$0xff]   ;;  %v506_v9 = vld [vmem:[#allocation7 + $0x60] sm:$0xff]   ;;  %483 = vmatprep.mubr.msk.bf16.mxu1 %vm653_vm0, %v652_v0  ;;  %s394_s23 = sshll.u32 %s654_s22, 4  ;;  %s395_s23 = int_to_ptr.vmem [resolvable:$true] %s394_s23 }
  0x4c   :  { %438 = vmatprep.subr.bf16.mxu0 %v500_v3  ;;  %v505_v8 = vld [vmem:[#allocation7 + $0x18] sm:$0xff]   ;;  %v507_v10 = vld [vmem:[#allocation7 + $0x20] sm:$0xff]   ;;  %v508_v11 = vld [vmem:[#allocation7 + $0x68] sm:$0xff]   ;;  %p621_p5 = scmp.lt.s32.totalorder %s395_s23, %s395_s23 }
  0x4d   :  { %v514_v12 = vld [vmem:[#allocation5] sm:$0xff]   ;;  %v509_v13 = vld [vmem:[#allocation7 + $0x28] sm:$0xff]   ;;  %v516_v14 = vld [vmem:[#allocation8] sm:$0xff]  }
  0x4e   :  { %263 = vmatprep.mubr.bf16.mxu0 %v514_v12  ;;  %v510_v15 = vld [vmem:[#allocation7 + $0x70] sm:$0xff]   ;;  %468 = vmatpush3.bf16.msra.mxu1 %v516_v14  ;;  %v517_v16 = vld [vmem:[#allocation8 + $0x8] sm:$0xff]   ;;  %v512_v18 = vld [vmem:[#allocation7 + $0x78] sm:$0xff]  }
  0x4f   :  { %439 = vmatpush3.bf16.msra.mxu0 %v501_v4  ;;  %v511_v17 = vld [vmem:[#allocation7 + $0x30] sm:$0xff]   ;;  %469 = vmatprep.subr.bf16.mxu1 %v652_v0  ;;  %v513_v20 = vld [vmem:[#allocation7 + $0x38] sm:$0xff]   ;;  %v520_v23 = vld [vmem:[#allocation8 + $0x20] sm:$0xff]  }
  0x50   :  { %440 = vmatprep.subr.bf16.mxu0 %v502_v5  ;;  %v518_v19 = vld [vmem:[#allocation8 + $0x10] sm:$0xff]   ;;  %v519_v22 = vld [vmem:[#allocation8 + $0x18] sm:$0xff]   ;;  %v521_v24 = vld [vmem:[#allocation8 + $0x28] sm:$0xff]  }
  0x51   :  { %v515_v21 = vld [vmem:[#allocation2] sm:$0xff]   ;;  %v523_v26 = vld [vmem:[#allocation8 + $0x38] sm:$0xff]  }
  0x52   :  { %470 = vmatpush3.bf16.msra.mxu1 %v517_v16  ;;  %v522_v25 = vld [vmem:[#allocation8 + $0x30] sm:$0xff]  }
  0x53   :  { %441 = vmatpush3.bf16.msra.mxu0 %v503_v6  ;;  %471 = vmatprep.subr.bf16.mxu1 %v652_v0  ;;  %v410_v28 = vld [vmem:[%s787_s3] ss:$0 sm:$0xff]  ;;  %s616_s3 = scalar_lea.vmem %s395_s23, 256 }
  0x54   :  { %442 = vmatprep.subr.bf16.mxu0 %v504_v7  ;;  %v427_v39 = vld [vmem:[%s789_s5] ss:$0 sm:$0xff]  ;;  %p617_p4 = scmp.ne.s32.totalorder %s395_s23, %s616_s3  ;;  %p622_p6 = scmp.lt.s32.totalorder %s616_s3, %s616_s3 }
  0x56   :  { %472 = vmatpush3.bf16.msra.mxu1 %v518_v19  ;;  %p623_p7 = por %p622_p6, %p621_p5 }
  0x57   :  { %443 = vmatpush3.bf16.msra.mxu0 %v505_v8  ;;  %473 = vmatprep.subr.bf16.mxu1 %v652_v0 }
  0x58   :  { %444 = vmatprep.subr.bf16.mxu0 %v506_v9  ;;  %p624_p8 = pnand %p623_p7, %p617_p4 }
  0x5a   :  { %474 = vmatpush3.bf16.msra.mxu1 %v519_v22 }
  0x5b   :  { %445 = vmatpush3.bf16.msra.mxu0 %v507_v10  ;;  %475 = vmatprep.subr.bf16.mxu1 %v652_v0 }
  0x5c   :  { %446 = vmatprep.subr.bf16.mxu0 %v508_v11 }
  0x5e   :  { %476 = vmatpush3.bf16.msra.mxu1 %v520_v23 }
  0x5f   :  { %447 = vmatpush3.bf16.msra.mxu0 %v509_v13  ;;  %477 = vmatprep.subr.bf16.mxu1 %v652_v0 }
  0x60   :  { %448 = vmatprep.subr.bf16.mxu0 %v510_v15 }
  0x62   :  { %478 = vmatpush3.bf16.msra.mxu1 %v521_v24 }
  0x63   :  { %449 = vmatpush3.bf16.msra.mxu0 %v511_v17  ;;  %479 = vmatprep.subr.bf16.mxu1 %v652_v0 }
  0x64   :  { %450 = vmatprep.subr.bf16.mxu0 %v512_v18 }
  0x66   :  { %480 = vmatpush3.bf16.msra.mxu1 %v522_v25 }
  0x67   :  { %451 = vmatpush3.bf16.msra.mxu0 %v513_v20  ;;  %481 = vmatprep.subr.bf16.mxu1 %v652_v0 }
  0x6a   :  { %264 = vmatmul.mubr.bf16.vlgmr.msra.gmra.mrb[0].mxu0 %v515_v21  ;;  %482 = vmatpush3.bf16.msra.mxu1 %v523_v26 }
 0x13d   :  { %v452_v27 = vpop.f32.mrb[0].mxu0 }
 0x13e   :  { %v453_v29 = vpop.f32.mrb[1].mxu0 }
 0x13f   :  { %v454_v30 = vadd.f32 %v453_v29, %v452_v27  ;;  %v455_v31 = vpop.f32.mrb[2].mxu0 }
 0x140   :  { %v456_v32 = vpop.f32.mrb[3].mxu0 }
 0x141   :  { %v266_v33 = vadd.f32 %v454_v30, %v410_v28  ;;  %v457_v34 = vadd.f32 %v456_v32, %v455_v31 }
 0x143   :  { %v269_v35 = vadd.f32 %v457_v34, %v410_v28  ;;  %524 = vtanh.f32 %v266_v33 }
 0x145   :  { %526 = vtanh.f32 %v269_v35 }
 0x14d   :  { %v525_v36 = vpop.eup %524 }
 0x14f   :  { %v527_v37 = vpop.eup %526 }
 0x150   :  { %v274_v38 = vpack.c.bf16 %v527_v37, %v525_v36 }
 0x152   :  { %484 = vmatmul.mubr.bf16.vlgmr.msra.gmra.mrb[0].mxu1 %v274_v38 }
 0x225   :  { %v380_v40 = vpop.f32.mrb[0].mxu1 }
 0x226   :  { %v381_v41 = vadd.f32 %v427_v39, %v380_v40  ;;  %v485_v42 = vpop.f32.mrb[1].mxu1 }
 0x227   :  { %v383_v43 = vpop.f32.mrb[2].mxu1 }
 0x228   :  { %387 = vst [vmem:[#allocation10] sm:$0xff] %v381_v41  ;;  %v384_v44 = vadd.f32 %v427_v39, %v383_v43  ;;  %v486_v45 = vpop.f32.mrb[3].mxu1 }
 0x22a   :  { %388 = vst [vmem:[#allocation10 + $0x8] sm:$0xff] %v384_v44 }
 0x22b   :  { %627 = shalt.err (!%p624_p8)
}
 0x22c   :  { %s628_s26 = scalar_lea.hbm %s790_s6, 256 }
 0x22d   :  { %p629_p9 = scmp.ne.s32.totalorder %s790_s6, %s628_s26  ;;  %p632_p10 = scmp.lt.u32.totalorder %s628_s26, %s790_s6 }
 0x22f   :  { %p634_p11 = pnand %p632_p10, %p629_p9 }
 0x231   :  { %637 = shalt.err (!%p634_p11)
}
 0x232   :  { %s655_s7 = smov 128   ;;  %s656_s8 = smov 8  }
 0x233   :  { %400 = dma.vmem_to_hbm [thread:$0]  %s395_s23, 256, %s790_s6, [#allocation4], %s655_s7, %s655_s7, %s656_s8  }
 0x234   :  { %644 = dma.done.wait [#allocation4], 256  }
 0x235   :  { %645 = vsyncadd [#allocation4], 4294967040 }
 0x236   :  { %404 = vsyncpa [#allocation3], 1 }
 0x237   :  { %405 = vsyncpa [#allocation6], 1 }
 0x238   :  { %406 = vsyncpa [#allocation9], 1 }
 0x239   :  { %407 = vsyncpa [#allocation4], 1 }

// kernel: tpu_custom_call.1
= control target key start
LH: loop header
LB: loop body
LE: loop exit
PB: predicated region body
PF: predicated region fallthrough
CT: control target
= control target key end

     0   :  { %11 = vsyncpa [#allocation3], 0  ;;  %s784_s0 = inlined_call_operand.hbm [shape: bf16[16,128], index: 0, kind: input, shape index: {}]   ;;  %s785_s1 = inlined_call_operand.hbm [shape: bf16[16,128], index: 1, kind: input, shape index: {}]   ;;  %s786_s2 = inlined_call_operand.hbm [shape: bf16[256,128], index: 2, kind: input, shape index: {}]   ;;  %s787_s3 = inlined_call_operand.vmem [shape: f32[1,128], index: 3, kind: input, shape index: {}]   ;;  %s788_s4 = inlined_call_operand.hbm [shape: bf16[128,128], index: 4, kind: input, shape index: {}]   ;;  %s789_s5 = inlined_call_operand.vmem [shape: f32[1,128], index: 5, kind: input, shape index: {}]   ;;  %s790_s6 = inlined_call_operand.hbm [shape: f32[16,128], index: 6, kind: output, shape index: {}]  }
   0x1   :  { %12 = vsyncpa [#allocation6], 0 }
   0x2   :  { %13 = vsyncpa [#allocation9], 0 }
   0x3   :  { %14 = vsyncpa [#allocation4], 0  ;;  %s646_s21 = smov [#allocation5]   ;;  %s647_s23 = smov [#allocation2]  }
   0x4   :  { %s32_s22 = sshll.u32 %s646_s21, 4  ;;  %s20_s24 = sshll.u32 %s647_s23, 4  ;;  %s33_s22 = int_to_ptr.vmem [resolvable:$true] %s32_s22  ;;  %s692_s24 = int_to_ptr.vmem [resolvable:$true] %s20_s24 }
   0x5   :  { %s528_s27 = scalar_lea.hbm %s785_s1, 128 }
   0x6   :  { %p529_p0 = scmp.ne.s32.totalorder %s785_s1, %s528_s27  ;;  %p532_p1 = scmp.lt.u32.totalorder %s528_s27, %s785_s1 }
   0x8   :  { %p534_p2 = pnand %p532_p1, %p529_p0 }
   0xa   :  { %537 = shalt.err (!%p534_p2)
}
   0xb   :  { %s538_s8 = scalar_lea.vmem %s33_s22, 128  ;;  %p543_p4 = scmp.lt.s32.totalorder %s33_s22, %s33_s22 }
   0xc   :  { %p539_p3 = scmp.ne.s32.totalorder %s33_s22, %s538_s8  ;;  %p544_p5 = scmp.lt.s32.totalorder %s538_s8, %s538_s8 }
   0xe   :  { %p545_p6 = por %p544_p5, %p543_p4 }
  0x10   :  { %p546_p7 = pnand %p545_p6, %p539_p3 }
  0x12   :  { %549 = shalt.err (!%p546_p7)
}
  0x13   :  { %s648_s9 = smov 64   ;;  %s649_s10 = smov 4  }
  0x14   :  { %38 = dma.hbm_to_vmem [thread:$0]  %s785_s1, 128, %s33_s22, [#allocation6], %s648_s9, %s648_s9, %s649_s10  }
  0x15   :  { %s550_s15 = scalar_lea.hbm %s784_s0, 128 }
  0x16   :  { %p551_p8 = scmp.ne.s32.totalorder %s784_s0, %s550_s15  ;;  %p554_p9 = scmp.lt.u32.totalorder %s550_s15, %s784_s0 }
  0x18   :  { %p556_p10 = pnand %p554_p9, %p551_p8 }
  0x1a   :  { %559 = shalt.err (!%p556_p10)
}
  0x1b   :  { %s560_s20 = scalar_lea.vmem %s692_s24, 128  ;;  %p565_p12 = scmp.lt.s32.totalorder %s692_s24, %s692_s24 }
  0x1c   :  { %p561_p11 = scmp.ne.s32.totalorder %s692_s24, %s560_s20  ;;  %p566_p13 = scmp.lt.s32.totalorder %s560_s20, %s560_s20 }
  0x1e   :  { %p567_p0 = por %p566_p13, %p565_p12 }
  0x20   :  { %p568_p1 = pnand %p567_p0, %p561_p11 }
  0x22   :  { %571 = shalt.err (!%p568_p1)
}
  0x23   :  { %26 = dma.hbm_to_vmem [thread:$0]  %s784_s0, 128, %s692_s24, [#allocation3], %s648_s9, %s648_s9, %s649_s10  }
  0x24   :  { %s650_s22 = smov [#allocation7]   ;;  %s651_s25 = smov [#allocation8]  }
  0x25   :  { %s44_s23 = sshll.u32 %s650_s22, 4  ;;  %s58_s26 = sshll.u32 %s651_s25, 4  ;;  %s45_s23 = int_to_ptr.vmem [resolvable:$true] %s44_s23  ;;  %s729_s26 = int_to_ptr.vmem [resolvable:$true] %s58_s26 }
  0x26   :  { %s572_s29 = scalar_lea.hbm %s786_s2, 2048 }
  0x27   :  { %p573_p2 = scmp.ne.s32.totalorder %s786_s2, %s572_s29  ;;  %p576_p3 = scmp.lt.u32.totalorder %s572_s29, %s786_s2 }
  0x29   :  { %p578_p4 = pnand %p576_p3, %p573_p2 }
  0x2b   :  { %581 = shalt.err (!%p578_p4)
}
  0x2c   :  { %s582_s0 = scalar_lea.vmem %s45_s23, 2048  ;;  %p587_p6 = scmp.lt.s32.totalorder %s45_s23, %s45_s23 }
  0x2d   :  { %p583_p5 = scmp.ne.s32.totalorder %s45_s23, %s582_s0  ;;  %p588_p7 = scmp.lt.s32.totalorder %s582_s0, %s582_s0 }
  0x2f   :  { %p589_p8 = por %p588_p7, %p587_p6 }
  0x31   :  { %p590_p9 = pnand %p589_p8, %p583_p5 }
  0x33   :  { %593 = shalt.err (!%p590_p9)
}
  0x34   :  { %50 = dma.hbm_to_vmem [thread:$0]  %s786_s2, 2048, %s45_s23, [#allocation6], %s648_s9, %s648_s9, %s649_s10  }
  0x35   :  { %s594_s15 = scalar_lea.hbm %s788_s4, 1024 }
  0x36   :  { %p595_p10 = scmp.ne.s32.totalorder %s788_s4, %s594_s15  ;;  %p598_p11 = scmp.lt.u32.totalorder %s594_s15, %s788_s4 }
  0x38   :  { %p600_p12 = pnand %p598_p11, %p595_p10 }
  0x3a   :  { %603 = shalt.err (!%p600_p12)
}
  0x3b   :  { %s604_s20 = scalar_lea.vmem %s729_s26, 1024  ;;  %p609_p0 = scmp.lt.s32.totalorder %s729_s26, %s729_s26 }
  0x3c   :  { %p605_p13 = scmp.ne.s32.totalorder %s729_s26, %s604_s20  ;;  %p610_p1 = scmp.lt.s32.totalorder %s604_s20, %s604_s20 }
  0x3e   :  { %p611_p2 = por %p610_p1, %p609_p0 }
  0x40   :  { %p612_p3 = pnand %p611_p2, %p605_p13 }
  0x42   :  { %615 = shalt.err (!%p612_p3)
}
  0x43   :  { %64 = dma.hbm_to_vmem [thread:$0]  %s788_s4, 1024, %s729_s26, [#allocation9], %s648_s9, %s648_s9, %s649_s10  }
  0x44   :  { %638 = dma.done.wait [#allocation3], 128  }
  0x45   :  { %639 = vsyncadd [#allocation3], 4294967168 }
  0x46   :  { %640 = dma.done.wait [#allocation6], 2176  }
  0x47   :  { %641 = vsyncadd [#allocation6], 4294965120 }
  0x48   :  { %642 = dma.done.wait [#allocation9], 1024  }
  0x49   :  { %643 = vsyncadd [#allocation9], 4294966272  ;;  %v652_v0 = vmov 0.0   ;;  %v498_v1 = vld [vmem:[#allocation7 + $0x40] sm:$0xff]   ;;  %v500_v3 = vld [vmem:[#allocation7 + $0x48] sm:$0xff]   ;;  %vm653_vm0 = vmmov 0  }
  0x4a   :  { %467 = vmatprep.subr.bf16.mxu1 %v652_v0  ;;  %v499_v2 = vld [vmem:[#allocation7] sm:$0xff]   ;;  %436 = vmatprep.subr.bf16.mxu0 %v498_v1  ;;  %v501_v4 = vld [vmem:[#allocation7 + $0x8] sm:$0xff]   ;;  %v502_v5 = vld [vmem:[#allocation7 + $0x50] sm:$0xff]   ;;  %s654_s22 = smov [#allocation10]  }
  0x4b   :  { %437 = vmatpush3.bf16.msra.mxu0 %v499_v2  ;;  %v503_v6 = vld [vmem:[#allocation7 + $0x10] sm:$0xff]   ;;  %v504_v7 = vld [vmem:[#allocation7 + $0x58] sm:$0xff]   ;;  %v506_v9 = vld [vmem:[#allocation7 + $0x60] sm:$0xff]   ;;  %483 = vmatprep.mubr.msk.bf16.mxu1 %vm653_vm0, %v652_v0  ;;  %s394_s23 = sshll.u32 %s654_s22, 4  ;;  %s395_s23 = int_to_ptr.vmem [resolvable:$true] %s394_s23 }
  0x4c   :  { %438 = vmatprep.subr.bf16.mxu0 %v500_v3  ;;  %v505_v8 = vld [vmem:[#allocation7 + $0x18] sm:$0xff]   ;;  %v507_v10 = vld [vmem:[#allocation7 + $0x20] sm:$0xff]   ;;  %v508_v11 = vld [vmem:[#allocation7 + $0x68] sm:$0xff]   ;;  %p621_p5 = scmp.lt.s32.totalorder %s395_s23, %s395_s23 }
  0x4d   :  { %v514_v12 = vld [vmem:[#allocation5] sm:$0xff]   ;;  %v509_v13 = vld [vmem:[#allocation7 + $0x28] sm:$0xff]   ;;  %v516_v14 = vld [vmem:[#allocation8] sm:$0xff]  }
  0x4e   :  { %263 = vmatprep.mubr.bf16.mxu0 %v514_v12  ;;  %v510_v15 = vld [vmem:[#allocation7 + $0x70] sm:$0xff]   ;;  %468 = vmatpush3.bf16.msra.mxu1 %v516_v14  ;;  %v517_v16 = vld [vmem:[#allocation8 + $0x8] sm:$0xff]   ;;  %v512_v18 = vld [vmem:[#allocation7 + $0x78] sm:$0xff]  }
  0x4f   :  { %439 = vmatpush3.bf16.msra.mxu0 %v501_v4  ;;  %v511_v17 = vld [vmem:[#allocation7 + $0x30] sm:$0xff]   ;;  %469 = vmatprep.subr.bf16.mxu1 %v652_v0  ;;  %v513_v20 = vld [vmem:[#allocation7 + $0x38] sm:$0xff]   ;;  %v520_v23 = vld [vmem:[#allocation8 + $0x20] sm:$0xff]  }
  0x50   :  { %440 = vmatprep.subr.bf16.mxu0 %v502_v5  ;;  %v518_v19 = vld [vmem:[#allocation8 + $0x10] sm:$0xff]   ;;  %v519_v22 = vld [vmem:[#allocation8 + $0x18] sm:$0xff]   ;;  %v521_v24 = vld [vmem:[#allocation8 + $0x28] sm:$0xff]  }
  0x51   :  { %v515_v21 = vld [vmem:[#allocation2] sm:$0xff]   ;;  %v523_v26 = vld [vmem:[#allocation8 + $0x38] sm:$0xff]  }
  0x52   :  { %470 = vmatpush3.bf16.msra.mxu1 %v517_v16  ;;  %v522_v25 = vld [vmem:[#allocation8 + $0x30] sm:$0xff]  }
  0x53   :  { %441 = vmatpush3.bf16.msra.mxu0 %v503_v6  ;;  %471 = vmatprep.subr.bf16.mxu1 %v652_v0  ;;  %v410_v28 = vld [vmem:[%s787_s3] ss:$0 sm:$0xff]  ;;  %s616_s3 = scalar_lea.vmem %s395_s23, 256 }
  0x54   :  { %442 = vmatprep.subr.bf16.mxu0 %v504_v7  ;;  %v427_v39 = vld [vmem:[%s789_s5] ss:$0 sm:$0xff]  ;;  %p617_p4 = scmp.ne.s32.totalorder %s395_s23, %s616_s3  ;;  %p622_p6 = scmp.lt.s32.totalorder %s616_s3, %s616_s3 }
  0x56   :  { %472 = vmatpush3.bf16.msra.mxu1 %v518_v19  ;;  %p623_p7 = por %p622_p6, %p621_p5 }
  0x57   :  { %443 = vmatpush3.bf16.msra.mxu0 %v505_v8  ;;  %473 = vmatprep.subr.bf16.mxu1 %v652_v0 }
  0x58   :  { %444 = vmatprep.subr.bf16.mxu0 %v506_v9  ;;  %p624_p8 = pnand %p623_p7, %p617_p4 }
  0x5a   :  { %474 = vmatpush3.bf16.msra.mxu1 %v519_v22 }
  0x5b   :  { %445 = vmatpush3.bf16.msra.mxu0 %v507_v10  ;;  %475 = vmatprep.subr.bf16.mxu1 %v652_v0 }
  0x5c   :  { %446 = vmatprep.subr.bf16.mxu0 %v508_v11 }
  0x5e   :  { %476 = vmatpush3.bf16.msra.mxu1 %v520_v23 }
  0x5f   :  { %447 = vmatpush3.bf16.msra.mxu0 %v509_v13  ;;  %477 = vmatprep.subr.bf16.mxu1 %v652_v0 }
  0x60   :  { %448 = vmatprep.subr.bf16.mxu0 %v510_v15 }
  0x62   :  { %478 = vmatpush3.bf16.msra.mxu1 %v521_v24 }
  0x63   :  { %449 = vmatpush3.bf16.msra.mxu0 %v511_v17  ;;  %479 = vmatprep.subr.bf16.mxu1 %v652_v0 }
  0x64   :  { %450 = vmatprep.subr.bf16.mxu0 %v512_v18 }
  0x66   :  { %480 = vmatpush3.bf16.msra.mxu1 %v522_v25 }
  0x67   :  { %451 = vmatpush3.bf16.msra.mxu0 %v513_v20  ;;  %481 = vmatprep.subr.bf16.mxu1 %v652_v0 }
  0x6a   :  { %264 = vmatmul.mubr.bf16.vlgmr.msra.gmra.mrb[0].mxu0 %v515_v21  ;;  %482 = vmatpush3.bf16.msra.mxu1 %v523_v26 }
 0x13d   :  { %v452_v27 = vpop.f32.mrb[0].mxu0 }
 0x13e   :  { %v453_v29 = vpop.f32.mrb[1].mxu0 }
 0x13f   :  { %v454_v30 = vadd.f32 %v453_v29, %v452_v27  ;;  %v455_v31 = vpop.f32.mrb[2].mxu0 }
 0x140   :  { %v456_v32 = vpop.f32.mrb[3].mxu0 }
 0x141   :  { %v266_v33 = vadd.f32 %v454_v30, %v410_v28  ;;  %v457_v34 = vadd.f32 %v456_v32, %v455_v31 }
 0x143   :  { %v269_v35 = vadd.f32 %v457_v34, %v410_v28  ;;  %524 = vtanh.f32 %v266_v33 }
 0x145   :  { %526 = vtanh.f32 %v269_v35 }
 0x14d   :  { %v525_v36 = vpop.eup %524 }
 0x14f   :  { %v527_v37 = vpop.eup %526 }
 0x150   :  { %v274_v38 = vpack.c.bf16 %v527_v37, %v525_v36 }
 0x152   :  { %484 = vmatmul.mubr.bf16.vlgmr.msra.gmra.mrb[0].mxu1 %v274_v38 }
 0x225   :  { %v380_v40 = vpop.f32.mrb[0].mxu1 }
 0x226   :  { %v381_v41 = vadd.f32 %v427_v39, %v380_v40  ;;  %v485_v42 = vpop.f32.mrb[1].mxu1 }
 0x227   :  { %v383_v43 = vpop.f32.mrb[2].mxu1 }
 0x228   :  { %387 = vst [vmem:[#allocation10] sm:$0xff] %v381_v41  ;;  %v384_v44 = vadd.f32 %v427_v39, %v383_v43  ;;  %v486_v45 = vpop.f32.mrb[3].mxu1 }
 0x22a   :  { %388 = vst [vmem:[#allocation10 + $0x8] sm:$0xff] %v384_v44 }
 0x22b   :  { %627 = shalt.err (!%p624_p8)
}
 0x22c   :  { %s628_s26 = scalar_lea.hbm %s790_s6, 256 }
 0x22d   :  { %p629_p9 = scmp.ne.s32.totalorder %s790_s6, %s628_s26  ;;  %p632_p10 = scmp.lt.u32.totalorder %s628_s26, %s790_s6 }
 0x22f   :  { %p634_p11 = pnand %p632_p10, %p629_p9 }
 0x231   :  { %637 = shalt.err (!%p634_p11)
}
 0x232   :  { %s655_s7 = smov 128   ;;  %s656_s8 = smov 8  }
 0x233   :  { %400 = dma.vmem_to_hbm [thread:$0]  %s395_s23, 256, %s790_s6, [#allocation4], %s655_s7, %s655_s7, %s656_s8  }
 0x234   :  { %644 = dma.done.wait [#allocation4], 256  }
 0x235   :  { %645 = vsyncadd [#allocation4], 4294967040 }
 0x236   :  { %404 = vsyncpa [#allocation3], 1 }
 0x237   :  { %405 = vsyncpa [#allocation6], 1 }
 0x238   :  { %406 = vsyncpa [#allocation9], 1 }
 0x239   :  { %407 = vsyncpa [#allocation4], 1 }

</bundles_post_ra>
